<compile_context>
chip_gen: v7x
topology: tpu7x:2x2x1
jax: 0.10.0
libtpu: 0.0.40
codegen_flags: <defaults>
</compile_context>

<pallas_src>
import functools
import math

import jax
import jax.numpy as jnp
from jax import lax
from jax.experimental import pallas as pl
from jax.experimental.pallas import tpu as pltpu


def _round_up(v, m):
    return ((v + m - 1) // m) * m


def _vmem_capacity_bytes():
    """Physical VMEM per TensorCore; conservative (v7x = 64 MiB) fallback."""
    try:
        cap = getattr(pltpu.get_tpu_info(), "vmem_capacity_bytes", None)
        if cap:
            return int(cap)
    except Exception:
        pass
    return 64 * 1024 * 1024


def _feedforward_kernel(x_ref, g_ref, beta_ref, w1_ref, b1_ref, w2_ref,
                        b2_ref, o_ref, xln_ref, acc_ref, *, real_dim,
                        gelu_approx):
    """Grid = (row tiles, hidden chunks).

    k == 0    : LayerNorm the row tile once, cache the MXU operand, zero acc.
    every k   : acc += GELU(xln @ W1[:, chunk k] + b1[chunk k]) @ W2[chunk k, :]
    k == last : out = acc + b2
    """
    k = pl.program_id(1)

    @pl.when(k == 0)
    def _init():
        x = x_ref[...].astype(jnp.float32)                      # (T, Dp)
        inv_d = jnp.float32(1.0 / real_dim)
        mean = jnp.sum(x, axis=-1, keepdims=True) * inv_d       # padded lanes are 0
        centered = x - mean
        if real_dim != x.shape[-1]:
            # Keep zero-padded lanes out of the variance.
            lane = lax.broadcasted_iota(jnp.int32, x.shape, 1)
            centered = jnp.where(lane < real_dim, centered, 0.0)
        var = jnp.sum(centered * centered, axis=-1, keepdims=True) * inv_d
        xhat = centered * lax.rsqrt(var + jnp.float32(1e-5))
        xln = xhat * g_ref[...] + beta_ref[...]                  # padded lanes -> 0
        xln_ref[...] = xln.astype(xln_ref.dtype)                 # cached MXU operand
        acc_ref[...] = jnp.zeros_like(acc_ref)

    # Linear(dim -> hidden chunk): f32 accumulation on the MXU.
    h = jnp.dot(xln_ref[...], w1_ref[...], preferred_element_type=jnp.float32)
    h = h + b1_ref[...]

    if gelu_approx:
        # tanh-approx GELU: the transcendental runs on the otherwise idle EUP.
        c = jnp.float32(math.sqrt(2.0 / math.pi))
        h = 0.5 * h * (1.0 + jnp.tanh(c * (h + jnp.float32(0.044715) * h * h * h)))
    else:
        # Exact erf GELU, matching PyTorch nn.GELU() default.
        h = 0.5 * h * (1.0 + lax.erf(h * jnp.float32(1.0 / math.sqrt(2.0))))

    # Linear(hidden chunk -> dim), accumulated over hidden chunks in f32.
    acc_ref[...] += jnp.dot(h.astype(w2_ref.dtype), w2_ref[...],
                            preferred_element_type=jnp.float32)

    @pl.when(k == pl.num_programs(1) - 1)
    def _finalize():
        o_ref[...] = (acc_ref[...] + b2_ref[...]).astype(o_ref.dtype)


def feedforward(x, gamma, beta, w1, b1, w2, b2, *,
                row_tile=512, hidden_tile=None,
                compute_dtype=jnp.bfloat16, gelu_approx=False):
    """x: (..., dim) -> (..., dim), matching FeedForward.forward.

    compute_dtype: MXU operand dtype for weights / LayerNorm output
      (bf16 default = perf; float32 = exact-weights path).
    hidden_tile:   force a hidden chunk size (None = auto, prefer resident).
    """
    orig_shape = x.shape
    dim = orig_shape[-1]
    hidden = w1.shape[1]

    x2d = x.reshape(-1, dim)
    n_rows = x2d.shape[0]

    f32 = jnp.float32
    cdt = jnp.dtype(compute_dtype)
    c_bytes = cdt.itemsize
    x_bytes = jnp.dtype(x.dtype).itemsize
    o_bytes = x_bytes

    # ---- lane-dense padding: dim / hidden up to multiples of 128 ----------
    dim_p = _round_up(dim, 128)
    hidden_p = _round_up(hidden, 128)

    # ---- row tiling --------------------------------------------------------
    # Multiple of 16 (packed-sublane xln cache).  Cap so there are >=2 row
    # tiles whenever the input permits: the "parallel" row axis is what
    # shards across v7x's two TensorCores.
    row_tile = min(row_tile, _round_up(n_rows, 16))
    if n_rows > 16:
        row_tile = min(row_tile, _round_up(-(-n_rows // 2), 16))
    row_tile = max(16, row_tile)

    # ---- per-generation VMEM budget ----------------------------------------
    # ~75% of physical VMEM: ~96 MiB on v5e/v6e (128 MiB), ~48 MiB on v7x (64 MiB).
    vmem_limit = min(max(_vmem_capacity_bytes() * 3 // 4, 32 * 1024 * 1024),
                     112 * 1024 * 1024)
    budget = int(vmem_limit * 0.85)     # headroom for compiler-internal scratch

    def vmem_use(rt, ht, wbufs):
        stream = 2 * rt * dim_p * (x_bytes + o_bytes)            # x + out (2-deep)
        weights = wbufs * (dim_p * ht + ht * dim_p) * c_bytes    # W1 + W2 buffers
        vectors = 2 * 8 * (3 * dim_p + max(ht, 128)) * 4         # gamma/beta/b2/b1
        scratch = rt * dim_p * (c_bytes + 4)                     # xln cache + f32 acc
        return stream + weights + vectors + scratch

    # Row-tile candidates, largest first.
    row_cands = []
    r = row_tile
    while r >= 16:
        row_cands.append(r)
        if r <= 16:
            break
        r = max(16, _round_up(r // 2, 16))

    # Hidden-tile candidates.  Residency (ht == hidden_p) is preferred; chunk
    # sizes must divide hidden_p exactly so no chunk is pure zero padding.
    if hidden_tile is not None:
        req = max(128, _round_up(min(hidden_tile, hidden_p), 128))
        while hidden_p % req:
            req -= 128
        ht_pref = [req]
    else:
        ht_pref = [hidden_p] + [c for c in (2048, 1024, 512, 256, 128)
                                if c < hidden_p and hidden_p % c == 0]

    sel = None
    for ht in ht_pref:                       # resident weights first
        wbufs = 2 if ht == hidden_p else 3   # chunked weights use Buffered(3)
        for rt in row_cands:                 # then largest row tile that fits
            if vmem_use(rt, ht, wbufs) <= budget:
                sel = (rt, ht)
                break
        if sel is not None:
            break
    if sel is None:
        sel = (16, 128)                      # last resort
    row_tile, hidden_tile = sel
    chunked = hidden_tile < hidden_p

    n_padded = _round_up(n_rows, row_tile)

    # ---- pad operands -------------------------------------------------------
    x2d = jnp.pad(x2d, ((0, n_padded - n_rows), (0, dim_p - dim)))
    g2d = jnp.pad(gamma.astype(f32), (0, dim_p - dim)).reshape(1, dim_p)
    be2d = jnp.pad(beta.astype(f32), (0, dim_p - dim)).reshape(1, dim_p)
    w1p = jnp.pad(w1, ((0, dim_p - dim), (0, hidden_p - hidden))).astype(cdt)
    b1p = jnp.pad(b1.astype(f32), (0, hidden_p - hidden)).reshape(1, hidden_p)
    w2p = jnp.pad(w2, ((0, hidden_p - hidden), (0, dim_p - dim))).astype(cdt)
    b2p = jnp.pad(b2.astype(f32), (0, dim_p - dim)).reshape(1, dim_p)

    grid = (n_padded // row_tile, hidden_p // hidden_tile)
    num_row_tiles = grid[0]

    # Weight-chunk specs get 3-deep buffering so the simultaneous W1/W2
    # re-fetch at a row-tile boundary hides behind the previous tile's
    # last k-steps.  Resident weights need no extra buffering (one DMA total).
    w_kwargs = {"pipeline_mode": pl.Buffered(3)} if chunked else {}

    in_specs = [
        pl.BlockSpec((row_tile, dim_p), lambda i, k: (i, 0)),                  # x
        pl.BlockSpec((1, dim_p), lambda i, k: (0, 0)),                         # gamma
        pl.BlockSpec((1, dim_p), lambda i, k: (0, 0)),                         # beta
        pl.BlockSpec((dim_p, hidden_tile), lambda i, k: (0, k), **w_kwargs),   # W1
        pl.BlockSpec((1, hidden_tile), lambda i, k: (0, k)),                   # b1
        pl.BlockSpec((hidden_tile, dim_p), lambda i, k: (k, 0), **w_kwargs),   # W2
        pl.BlockSpec((1, dim_p), lambda i, k: (0, 0)),                         # b2
    ]

    # Bytes estimate reflects actual weight traffic: once total when resident,
    # once per row tile when chunked.
    weight_passes = 1 if not chunked else num_row_tiles
    cost = pl.CostEstimate(
        flops=4 * n_padded * dim_p * hidden_p,                 # two matmuls
        transcendentals=n_padded * hidden_p,                   # GELU
        bytes_accessed=(x2d.size * x_bytes
                        + n_padded * dim_p * o_bytes
                        + weight_passes * (w1p.size + w2p.size) * c_bytes
                        + (g2d.size + be2d.size + b1p.size + b2p.size) * 4),
    )

    kernel = functools.partial(_feedforward_kernel, real_dim=dim,
                               gelu_approx=gelu_approx)

    out = pl.pallas_call(
        kernel,
        out_shape=jax.ShapeDtypeStruct((n_padded, dim_p), x.dtype),
        grid_spec=pltpu.PrefetchScalarGridSpec(
            num_scalar_prefetch=0,
            grid=grid,
            in_specs=in_specs,
            out_specs=pl.BlockSpec((row_tile, dim_p), lambda i, k: (i, 0)),
            scratch_shapes=[
                pltpu.VMEM((row_tile, dim_p), cdt),   # cached LayerNorm output
                pltpu.VMEM((row_tile, dim_p), f32),   # second-matmul accumulator
            ],
        ),
        compiler_params=pltpu.CompilerParams(
            dimension_semantics=("parallel", "arbitrary"),
            vmem_limit_bytes=int(vmem_limit),
        ),
        cost_estimate=cost,
    )(x2d, g2d, be2d, w1p, b1p, w2p, b2p)

    return out[:n_rows, :dim].reshape(orig_shape)


def _reference(x, gamma, beta, w1, b1, w2, b2):
    xf = x.astype(jnp.float32)
    mean = jnp.mean(xf, axis=-1, keepdims=True)
    var = jnp.mean(jnp.square(xf - mean), axis=-1, keepdims=True)
    xln = (xf - mean) / jnp.sqrt(var + 1e-5) * gamma + beta
    h = xln @ w1 + b1
    h = 0.5 * h * (1.0 + lax.erf(h / jnp.sqrt(2.0)))
    return (h @ w2 + b2).astype(x.dtype)


def _make_inputs(key, batch, seq, dim, hidden_dim):
    kx, kg, kb, kw1, kb1, kw2, kb2 = jax.random.split(key, 7)
    x = jax.random.normal(kx, (batch, seq, dim), dtype=jnp.float32)
    gamma = 1.0 + 0.1 * jax.random.normal(kg, (dim,), jnp.float32)
    beta = 0.1 * jax.random.normal(kb, (dim,), jnp.float32)
    # Linear weights stored as (in, out); PyTorch keeps (out, in) and applies
    # x @ W.T, which is equivalent to x @ w1 here.
    w1 = jax.random.normal(kw1, (dim, hidden_dim), jnp.float32) / math.sqrt(dim)
    b1 = 0.01 * jax.random.normal(kb1, (hidden_dim,), jnp.float32)
    w2 = jax.random.normal(kw2, (hidden_dim, dim), jnp.float32) / math.sqrt(hidden_dim)
    b2 = 0.01 * jax.random.normal(kb2, (dim,), jnp.float32)
    return x, gamma, beta, w1, b1, w2, b2


if __name__ == "__main__":
    key = jax.random.PRNGKey(0)
    k1, k2 = jax.random.split(key)

    # Test 1: small ViT-like feedforward, exercises the resident-weights path.
    args1 = _make_inputs(k1, batch=2, seq=8, dim=32, hidden_dim=64)
    out1 = jax.block_until_ready(feedforward(*args1))
    ref1 = _reference(*args1)
    assert out1.shape == args1[0].shape
    # bf16 MXU operands with f32 accumulation -> looser tolerance vs f32 ref.
    assert jnp.allclose(out1, ref1, atol=5e-2, rtol=5e-2), \
        float(jnp.max(jnp.abs(out1 - ref1)))

    # Test 2: force the chunked-hidden fallback (Buffered(3) weight chunks,
    # multi-step accumulator, >=2 row tiles for the dual-TC case).
    args2 = _make_inputs(k2, batch=4, seq=24, dim=128, hidden_dim=512)
    out2 = jax.block_until_ready(feedforward(*args2, hidden_tile=128))
    ref2 = _reference(*args2)
    assert out2.shape == args2[0].shape
    assert jnp.allclose(out2, ref2, atol=5e-2, rtol=5e-2), \
        float(jnp.max(jnp.abs(out2 - ref2)))

    print("KERNEL_OK")
</pallas_src>

<mosaic_0001>
module attributes {stable_mosaic.version = 11 : i64} {
  func.func @_feedforward_kernel(%arg0: i32, %arg1: i32, %arg2: memref<16x128xf32, #tpu.memory_space<vmem>>, %arg3: memref<1x128xf32, #tpu.memory_space<vmem>>, %arg4: memref<1x128xf32, #tpu.memory_space<vmem>>, %arg5: memref<128x128xbf16, #tpu.memory_space<vmem>>, %arg6: memref<1x128xf32, #tpu.memory_space<vmem>>, %arg7: memref<128x128xbf16, #tpu.memory_space<vmem>>, %arg8: memref<1x128xf32, #tpu.memory_space<vmem>>, %arg9: memref<16x128xf32, #tpu.memory_space<vmem>>, %arg10: memref<16x128xbf16, #tpu.memory_space<vmem>>, %arg11: memref<16x128xf32, #tpu.memory_space<vmem>>) attributes {dimension_semantics = [#tpu.dimension_semantics<parallel>, #tpu.dimension_semantics<arbitrary>], iteration_bounds = array<i64: 1, 1>, scalar_prefetch = 0 : i64, scratch_operands = 2 : i64, tpu.core_type = #tpu.core_type<tc>, window_params = [{transform_indices = @transform_0, window_bounds = array<i64: 16, 128>}, {pipeline_mode = #tpu.pipeline_mode<synchronous>, transform_indices = @transform_1, window_bounds = array<i64: 1, 128>}, {pipeline_mode = #tpu.pipeline_mode<synchronous>, transform_indices = @transform_2, window_bounds = array<i64: 1, 128>}, {transform_indices = @transform_3, window_bounds = array<i64: 128, 128>}, {transform_indices = @transform_4, window_bounds = array<i64: 1, 128>}, {transform_indices = @transform_5, window_bounds = array<i64: 128, 128>}, {pipeline_mode = #tpu.pipeline_mode<synchronous>, transform_indices = @transform_6, window_bounds = array<i64: 1, 128>}, {transform_indices = @transform_7, window_bounds = array<i64: 16, 128>}]} {
    %c0_i32 = arith.constant 0 : i32
    %0 = arith.cmpi eq, %arg1, %c0_i32 : i32
    %1 = arith.extui %0 : i1 to i32
    %c0_i32_0 = arith.constant 0 : i32
    %2 = arith.cmpi ne, %1, %c0_i32_0 : i32
    scf.if %2 {
      %c0_18 = arith.constant 0 : index
      %c0_19 = arith.constant 0 : index
      %26 = vector.load %arg2[%c0_18, %c0_19] : memref<16x128xf32, #tpu.memory_space<vmem>>, vector<16x128xf32>
      %cst_20 = arith.constant dense<0.000000e+00> : vector<16xf32>
      %27 = vector.multi_reduction <add>, %26, %cst_20 [1] : vector<16x128xf32> to vector<16xf32>
      %28 = vector.shape_cast %27 : vector<16xf32> to vector<16x1xf32>
      %cst_21 = arith.constant 3.125000e-02 : f32
      %29 = vector.broadcast %cst_21 : f32 to vector<16x1xf32>
      %30 = arith.mulf %28, %29 : vector<16x1xf32>
      %31 = vector.broadcast %30 : vector<16x1xf32> to vector<16x128xf32>
      %32 = arith.subf %26, %31 : vector<16x128xf32>
      %33 = tpu.iota {dimensions = array<i32: 1>} : vector<16x128xi32>
      %c32_i32 = arith.constant 32 : i32
      %34 = vector.broadcast %c32_i32 : i32 to vector<16x128xi32>
      %35 = arith.cmpi slt, %33, %34 : vector<16x128xi32>
      %cst_22 = arith.constant 0.000000e+00 : f32
      %36 = vector.broadcast %cst_22 : f32 to vector<16x128xf32>
      %37 = arith.select %35, %32, %36 : vector<16x128xi1>, vector<16x128xf32>
      %38 = arith.mulf %37, %37 : vector<16x128xf32>
      %cst_23 = arith.constant dense<0.000000e+00> : vector<16xf32>
      %39 = vector.multi_reduction <add>, %38, %cst_23 [1] : vector<16x128xf32> to vector<16xf32>
      %40 = vector.shape_cast %39 : vector<16xf32> to vector<16x1xf32>
      %cst_24 = arith.constant 3.125000e-02 : f32
      %41 = vector.broadcast %cst_24 : f32 to vector<16x1xf32>
      %42 = arith.mulf %40, %41 : vector<16x1xf32>
      %cst_25 = arith.constant 9.99999974E-6 : f32
      %43 = vector.broadcast %cst_25 : f32 to vector<16x1xf32>
      %44 = arith.addf %42, %43 : vector<16x1xf32>
      %45 = math.rsqrt %44 : vector<16x1xf32>
      %46 = vector.broadcast %45 : vector<16x1xf32> to vector<16x128xf32>
      %47 = arith.mulf %37, %46 : vector<16x128xf32>
      %c0_26 = arith.constant 0 : index
      %c0_27 = arith.constant 0 : index
      %48 = vector.load %arg3[%c0_26, %c0_27] : memref<1x128xf32, #tpu.memory_space<vmem>>, vector<1x128xf32>
      %49 = vector.broadcast %48 : vector<1x128xf32> to vector<16x128xf32>
      %50 = arith.mulf %47, %49 : vector<16x128xf32>
      %c0_28 = arith.constant 0 : index
      %c0_29 = arith.constant 0 : index
      %51 = vector.load %arg4[%c0_28, %c0_29] : memref<1x128xf32, #tpu.memory_space<vmem>>, vector<1x128xf32>
      %52 = vector.broadcast %51 : vector<1x128xf32> to vector<16x128xf32>
      %53 = arith.addf %50, %52 : vector<16x128xf32>
      %54 = arith.truncf %53 : vector<16x128xf32> to vector<16x128xbf16>
      %c0_30 = arith.constant 0 : index
      %c0_31 = arith.constant 0 : index
      %55 = vector.load %arg10[%c0_30, %c0_31] : memref<16x128xbf16, #tpu.memory_space<vmem>>, vector<16x128xbf16>
      tpu.vector_store %arg10[%c0_30, %c0_31], %54 {strides = array<i32>} : memref<16x128xbf16, #tpu.memory_space<vmem>>, vector<16x128xbf16>,
      %cst_32 = arith.constant 0.000000e+00 : f32
      %56 = vector.broadcast %cst_32 : f32 to vector<16x128xf32>
      %c0_33 = arith.constant 0 : index
      %c0_34 = arith.constant 0 : index
      %57 = vector.load %arg11[%c0_33, %c0_34] : memref<16x128xf32, #tpu.memory_space<vmem>>, vector<16x128xf32>
      tpu.vector_store %arg11[%c0_33, %c0_34], %56 {strides = array<i32>} : memref<16x128xf32, #tpu.memory_space<vmem>>, vector<16x128xf32>,
    } else {
    }
    %c0 = arith.constant 0 : index
    %c0_1 = arith.constant 0 : index
    %3 = vector.load %arg10[%c0, %c0_1] : memref<16x128xbf16, #tpu.memory_space<vmem>>, vector<16x128xbf16>
    %c0_2 = arith.constant 0 : index
    %c0_3 = arith.constant 0 : index
    %4 = vector.load %arg5[%c0_2, %c0_3] : memref<128x128xbf16, #tpu.memory_space<vmem>>, vector<128x128xbf16>
    %cst = arith.constant dense<0.000000e+00> : vector<16x128xf32>
    %5 = tpu.matmul %3, %4, %cst {dimension_numbers = #tpu.dot_dimension_numbers<[1], [0], [0], [1], [0, 0, 1, 1], [], []>} : vector<16x128xbf16>, vector<128x128xbf16>, vector<16x128xf32> -> vector<16x128xf32>
    %c0_4 = arith.constant 0 : index
    %c0_5 = arith.constant 0 : index
    %6 = vector.load %arg6[%c0_4, %c0_5] : memref<1x128xf32, #tpu.memory_space<vmem>>, vector<1x128xf32>
    %7 = vector.broadcast %6 : vector<1x128xf32> to vector<16x128xf32>
    %8 = arith.addf %5, %7 : vector<16x128xf32>
    %cst_6 = arith.constant 5.000000e-01 : f32
    %9 = vector.broadcast %cst_6 : f32 to vector<16x128xf32>
    %10 = arith.mulf %9, %8 : vector<16x128xf32>
    %cst_7 = arith.constant 0.707106769 : f32
    %11 = vector.broadcast %cst_7 : f32 to vector<16x128xf32>
    %12 = arith.mulf %8, %11 : vector<16x128xf32>
    %13 = math.erf %12 : vector<16x128xf32>
    %cst_8 = arith.constant 1.000000e+00 : f32
    %14 = vector.broadcast %cst_8 : f32 to vector<16x128xf32>
    %15 = arith.addf %14, %13 : vector<16x128xf32>
    %16 = arith.mulf %10, %15 : vector<16x128xf32>
    %c0_9 = arith.constant 0 : index
    %c0_10 = arith.constant 0 : index
    %17 = vector.load %arg11[%c0_9, %c0_10] : memref<16x128xf32, #tpu.memory_space<vmem>>, vector<16x128xf32>
    %18 = arith.truncf %16 : vector<16x128xf32> to vector<16x128xbf16>
    %c0_11 = arith.constant 0 : index
    %c0_12 = arith.constant 0 : index
    %19 = vector.load %arg7[%c0_11, %c0_12] : memref<128x128xbf16, #tpu.memory_space<vmem>>, vector<128x128xbf16>
    %cst_13 = arith.constant dense<0.000000e+00> : vector<16x128xf32>
    %20 = tpu.matmul %18, %19, %cst_13 {dimension_numbers = #tpu.dot_dimension_numbers<[1], [0], [0], [1], [0, 0, 1, 1], [], []>} : vector<16x128xbf16>, vector<128x128xbf16>, vector<16x128xf32> -> vector<16x128xf32>
    %21 = arith.addf %17, %20 : vector<16x128xf32>
    %c0_14 = arith.constant 0 : index
    %c0_15 = arith.constant 0 : index
    %22 = vector.load %arg11[%c0_14, %c0_15] : memref<16x128xf32, #tpu.memory_space<vmem>>, vector<16x128xf32>
    tpu.vector_store %arg11[%c0_14, %c0_15], %21 {strides = array<i32>} : memref<16x128xf32, #tpu.memory_space<vmem>>, vector<16x128xf32>,
    %c0_i32_16 = arith.constant 0 : i32
    %23 = arith.cmpi eq, %arg1, %c0_i32_16 : i32
    %24 = arith.extui %23 : i1 to i32
    %c0_i32_17 = arith.constant 0 : i32
    %25 = arith.cmpi ne, %24, %c0_i32_17 : i32
    scf.if %25 {
      %c0_18 = arith.constant 0 : index
      %c0_19 = arith.constant 0 : index
      %26 = vector.load %arg11[%c0_18, %c0_19] : memref<16x128xf32, #tpu.memory_space<vmem>>, vector<16x128xf32>
      %c0_20 = arith.constant 0 : index
      %c0_21 = arith.constant 0 : index
      %27 = vector.load %arg8[%c0_20, %c0_21] : memref<1x128xf32, #tpu.memory_space<vmem>>, vector<1x128xf32>
      %28 = vector.broadcast %27 : vector<1x128xf32> to vector<16x128xf32>
      %29 = arith.addf %26, %28 : vector<16x128xf32>
      %c0_22 = arith.constant 0 : index
      %c0_23 = arith.constant 0 : index
      %30 = vector.load %arg9[%c0_22, %c0_23] : memref<16x128xf32, #tpu.memory_space<vmem>>, vector<16x128xf32>
      tpu.vector_store %arg9[%c0_22, %c0_23], %29 {strides = array<i32>} : memref<16x128xf32, #tpu.memory_space<vmem>>, vector<16x128xf32>,
    } else {
    }
    return
  }
  func.func @transform_0(%arg0: i32, %arg1: i32) -> (i32, i32) {
    %c0_i32 = arith.constant 0 : i32
    %c0_i32_0 = arith.constant 0 : i32
    return %arg0, %c0_i32 : i32, i32
  }
  func.func @transform_1(%arg0: i32, %arg1: i32) -> (i32, i32) {
    %c0_i32 = arith.constant 0 : i32
    %c0_i32_0 = arith.constant 0 : i32
    %c0_i32_1 = arith.constant 0 : i32
    return %c0_i32, %c0_i32_0 : i32, i32
  }
  func.func @transform_2(%arg0: i32, %arg1: i32) -> (i32, i32) {
    %c0_i32 = arith.constant 0 : i32
    %c0_i32_0 = arith.constant 0 : i32
    %c0_i32_1 = arith.constant 0 : i32
    return %c0_i32, %c0_i32_0 : i32, i32
  }
  func.func @transform_3(%arg0: i32, %arg1: i32) -> (i32, i32) {
    %c0_i32 = arith.constant 0 : i32
    %c0_i32_0 = arith.constant 0 : i32
    return %c0_i32, %arg1 : i32, i32
  }
  func.func @transform_4(%arg0: i32, %arg1: i32) -> (i32, i32) {
    %c0_i32 = arith.constant 0 : i32
    %c0_i32_0 = arith.constant 0 : i32
    return %c0_i32, %arg1 : i32, i32
  }
  func.func @transform_5(%arg0: i32, %arg1: i32) -> (i32, i32) {
    %c0_i32 = arith.constant 0 : i32
    %c0_i32_0 = arith.constant 0 : i32
    return %arg1, %c0_i32 : i32, i32
  }
  func.func @transform_6(%arg0: i32, %arg1: i32) -> (i32, i32) {
    %c0_i32 = arith.constant 0 : i32
    %c0_i32_0 = arith.constant 0 : i32
    %c0_i32_1 = arith.constant 0 : i32
    return %c0_i32, %c0_i32_0 : i32, i32
  }
  func.func @transform_7(%arg0: i32, %arg1: i32) -> (i32, i32) {
    %c0_i32 = arith.constant 0 : i32
    %c0_i32_0 = arith.constant 0 : i32
    return %arg0, %c0_i32 : i32, i32
  }
}

</mosaic_0001>

<bundles_post_ra>
// kernel: tpu_custom_call.1
= control target key start
LH: loop header
LB: loop body
LE: loop exit
PB: predicated region body
PF: predicated region fallthrough
CT: control target
= control target key end

     0   :  { %12 = vsyncpa [#allocation5], 0  ;;  %s739_s0 = inlined_call_operand.hbm [shape: f32[16,128], index: 0, kind: input, shape index: {}]   ;;  %s740_s1 = inlined_call_operand.vmem [shape: f32[1,128], index: 1, kind: input, shape index: {}]   ;;  %s741_s2 = inlined_call_operand.vmem [shape: f32[1,128], index: 2, kind: input, shape index: {}]   ;;  %s742_s3 = inlined_call_operand.hbm [shape: bf16[128,128], index: 3, kind: input, shape index: {}]   ;;  %s743_s4 = inlined_call_operand.vmem [shape: f32[1,128], index: 4, kind: input, shape index: {}]   ;;  %s744_s5 = inlined_call_operand.hbm [shape: bf16[128,128], index: 5, kind: input, shape index: {}]   ;;  %s745_s6 = inlined_call_operand.vmem [shape: f32[1,128], index: 6, kind: input, shape index: {}]   ;;  %s746_s7 = inlined_call_operand.hbm [shape: f32[16,128], index: 7, kind: output, shape index: {}]  }
   0x1   :  { %13 = vsyncpa [#allocation8], 0 }
   0x2   :  { %14 = vsyncpa [#allocation6], 0  ;;  %s599_s24 = smov [#allocation7]   ;;  %s505_s28 = scalar_lea.hbm %s742_s3, 1024 }
   0x3   :  { %s36_s25 = sshll.u32 %s599_s24, 4  ;;  %p506_p0 = scmp.ne.s32.totalorder %s742_s3, %s505_s28  ;;  %s37_s25 = int_to_ptr.vmem [resolvable:$true] %s36_s25 }
   0x4   :  { %p509_p1 = scmp.lt.u32.totalorder %s505_s28, %s742_s3 }
   0x6   :  { %p511_p2 = pnand %p509_p1, %p506_p0 }
   0x8   :  { %514 = shalt.err (!%p511_p2)
}
   0x9   :  { %s515_s10 = scalar_lea.vmem %s37_s25, 1024  ;;  %p520_p4 = scmp.lt.s32.totalorder %s37_s25, %s37_s25 }
   0xa   :  { %p516_p3 = scmp.ne.s32.totalorder %s37_s25, %s515_s10  ;;  %p521_p5 = scmp.lt.s32.totalorder %s515_s10, %s515_s10 }
   0xc   :  { %p522_p6 = por %p521_p5, %p520_p4 }
   0xe   :  { %p523_p7 = pnand %p522_p6, %p516_p3 }
  0x10   :  { %526 = shalt.err (!%p523_p7)
}
  0x11   :  { %s600_s11 = smov 64   ;;  %s601_s12 = smov 4  }
  0x12   :  { %42 = dma.hbm_to_vmem [thread:$0]  %s742_s3, 1024, %s37_s25, [#allocation8], %s600_s11, %s600_s11, %s601_s12  }
  0x13   :  { %s602_s15 = smov [#allocation4]   ;;  %s527_s19 = scalar_lea.hbm %s739_s0, 256 }
  0x14   :  { %s20_s16 = sshll.u32 %s602_s15, 4  ;;  %p528_p8 = scmp.ne.s32.totalorder %s739_s0, %s527_s19  ;;  %s21_s16 = int_to_ptr.vmem [resolvable:$true] %s20_s16 }
  0x15   :  { %p531_p9 = scmp.lt.u32.totalorder %s527_s19, %s739_s0 }
  0x17   :  { %p533_p10 = pnand %p531_p9, %p528_p8 }
  0x19   :  { %536 = shalt.err (!%p533_p10)
}
  0x1a   :  { %s537_s24 = scalar_lea.vmem %s21_s16, 256  ;;  %p542_p12 = scmp.lt.s32.totalorder %s21_s16, %s21_s16 }
  0x1b   :  { %p538_p11 = scmp.ne.s32.totalorder %s21_s16, %s537_s24  ;;  %p543_p13 = scmp.lt.s32.totalorder %s537_s24, %s537_s24 }
  0x1d   :  { %p544_p0 = por %p543_p13, %p542_p12 }
  0x1f   :  { %p545_p1 = pnand %p544_p0, %p538_p11 }
  0x21   :  { %548 = shalt.err (!%p545_p1)
}
  0x22   :  { %s603_s3 = smov 128   ;;  %s604_s25 = smov 8  }
  0x23   :  { %26 = dma.hbm_to_vmem [thread:$0]  %s739_s0, 256, %s21_s16, [#allocation5], %s603_s3, %s603_s3, %s604_s25  }
  0x24   :  { %s605_s28 = smov [#allocation9]   ;;  %s549_s9 = scalar_lea.hbm %s744_s5, 1024 }
  0x25   :  { %s50_s29 = sshll.u32 %s605_s28, 4  ;;  %p550_p2 = scmp.ne.s32.totalorder %s744_s5, %s549_s9  ;;  %s51_s29 = int_to_ptr.vmem [resolvable:$true] %s50_s29 }
  0x26   :  { %p553_p3 = scmp.lt.u32.totalorder %s549_s9, %s744_s5 }
  0x28   :  { %p555_p4 = pnand %p553_p3, %p550_p2 }
  0x2a   :  { %558 = shalt.err (!%p555_p4)
}
  0x2b   :  { %s559_s17 = scalar_lea.vmem %s51_s29, 1024  ;;  %p564_p6 = scmp.lt.s32.totalorder %s51_s29, %s51_s29 }
  0x2c   :  { %p560_p5 = scmp.ne.s32.totalorder %s51_s29, %s559_s17  ;;  %p565_p7 = scmp.lt.s32.totalorder %s559_s17, %s559_s17 }
  0x2e   :  { %p566_p8 = por %p565_p7, %p564_p6 }
  0x30   :  { %p567_p9 = pnand %p566_p8, %p560_p5 }
  0x32   :  { %570 = shalt.err (!%p567_p9)
}
  0x33   :  { %56 = dma.hbm_to_vmem [thread:$0]  %s744_s5, 1024, %s51_s29, [#allocation8], %s600_s11, %s600_s11, %s601_s12  }
  0x34   :  { %593 = dma.done.wait [#allocation5], 256  }
  0x35   :  { %594 = vsyncadd [#allocation5], 4294967040 }
  0x36   :  { %595 = dma.done.wait [#allocation8], 2048  }
  0x37   :  { %596 = vsyncadd [#allocation8], 4294965248  ;;  %v73_v0 = vld [vmem:[#allocation4] sm:$0xff]  ;;  %v74_v1 = vld [vmem:[#allocation4 + $0x8] sm:$0xff]  ;;  %v606_v3 = vmov 0.0   ;;  %v83_v4 = vlaneseq  ;;  %vm607_vm1 = vmmov 0  }
  0x38   :  { %75 = vadd.xlane.f32.xlu0 %v73_v0  ;;  %v481_v2 = vld [vmem:[#allocation7] sm:$0xff]   ;;  %431 = vmatprep.subr.bf16.mxu0 %v606_v3  ;;  %v482_v16 = vld [vmem:[#allocation7 + $0x8] sm:$0xff]   ;;  %v483_v17 = vld [vmem:[#allocation7 + $0x10] sm:$0xff]   ;;  %s608_s20 = smov [#allocation10]  }
  0x39   :  { %451 = vmatprep.subr.bf16.mxu1 %v606_v3  ;;  %432 = vmatpush3.bf16.msra.mxu0 %v481_v2  ;;  %v84_v5 = vand.u32 127, %v83_v4  ;;  %v484_v18 = vld [vmem:[#allocation7 + $0x18] sm:$0xff]   ;;  %v485_v19 = vld [vmem:[#allocation7 + $0x20] sm:$0xff]   ;;  %v486_v20 = vld [vmem:[#allocation7 + $0x28] sm:$0xff]   ;;  %s380_s21 = sshll.u32 %s608_s20, 4  ;;  %s381_s21 = int_to_ptr.vmem [resolvable:$true] %s380_s21 }
  0x3a   :  { %433 = vmatprep.subr.bf16.mxu0 %v606_v3  ;;  %447 = vmatprep.mubr.msk.bf16.mxu0 %vm607_vm1, %v606_v3  ;;  %v487_v21 = vld [vmem:[#allocation7 + $0x30] sm:$0xff]   ;;  %v488_v22 = vld [vmem:[#allocation7 + $0x38] sm:$0xff]   ;;  %v489_v23 = vld [vmem:[#allocation9] sm:$0xff]   ;;  %s571_s22 = scalar_lea.vmem %s381_s21, 256  ;;  %p576_p11 = scmp.lt.s32.totalorder %s381_s21, %s381_s21 }
  0x3b   :  { %vm85_vm0 = vcmp.lt.s32.totalorder %v84_v5, 32  ;;  %467 = vmatprep.mubr.msk.bf16.mxu1 %vm607_vm1, %v606_v3  ;;  %452 = vmatpush3.bf16.msra.mxu1 %v489_v23  ;;  %v490_v24 = vld [vmem:[#allocation9 + $0x8] sm:$0xff]   ;;  %v393_v33 = vld [vmem:[%s740_s1] ss:$0 sm:$0xff]  ;;  %v492_v43 = vld [vmem:[#allocation9 + $0x18] sm:$0xff]   ;;  %p572_p10 = scmp.ne.s32.totalorder %s381_s21, %s571_s22  ;;  %p577_p12 = scmp.lt.s32.totalorder %s571_s22, %s571_s22 }
  0x3c   :  { %77 = vadd.xlane.f32.xlu0 %v74_v1  ;;  %453 = vmatprep.subr.bf16.mxu1 %v606_v3  ;;  %v394_v37 = vld [vmem:[%s741_s2] ss:$0 sm:$0xff]  ;;  %v493_v44 = vld [vmem:[#allocation9 + $0x20] sm:$0xff]   ;;  %v494_v45 = vld [vmem:[#allocation9 + $0x28] sm:$0xff]  }
  0x3d   :  { %434 = vmatpush3.bf16.msra.mxu0 %v482_v16  ;;  %v491_v42 = vld [vmem:[#allocation9 + $0x10] sm:$0xff]   ;;  %v496_v47 = vld [vmem:[#allocation9 + $0x38] sm:$0xff]   ;;  %p578_p13 = por %p577_p12, %p576_p11 }
  0x3e   :  { %435 = vmatprep.subr.bf16.mxu0 %v606_v3  ;;  %v495_v46 = vld [vmem:[#allocation9 + $0x30] sm:$0xff]  }
  0x3f   :  { %454 = vmatpush3.bf16.msra.mxu1 %v490_v24  ;;  %v395_v48 = vld [vmem:[%s743_s4] ss:$0 sm:$0xff]  ;;  %p579_p0 = pnand %p578_p13, %p572_p10 }
  0x40   :  { %455 = vmatprep.subr.bf16.mxu1 %v606_v3  ;;  %v412_v2 = vld [vmem:[%s745_s6] ss:$0 sm:$0xff] }
  0x41   :  { %436 = vmatpush3.bf16.msra.mxu0 %v483_v17 }
  0x42   :  { %437 = vmatprep.subr.bf16.mxu0 %v606_v3 }
  0x43   :  { %456 = vmatpush3.bf16.msra.mxu1 %v491_v42 }
  0x44   :  { %457 = vmatprep.subr.bf16.mxu1 %v606_v3 }
  0x45   :  { %438 = vmatpush3.bf16.msra.mxu0 %v484_v18 }
  0x46   :  { %439 = vmatprep.subr.bf16.mxu0 %v606_v3 }
  0x47   :  { %458 = vmatpush3.bf16.msra.mxu1 %v492_v43 }
  0x48   :  { %459 = vmatprep.subr.bf16.mxu1 %v606_v3 }
  0x49   :  { %440 = vmatpush3.bf16.msra.mxu0 %v485_v19 }
  0x4a   :  { %441 = vmatprep.subr.bf16.mxu0 %v606_v3 }
  0x4b   :  { %460 = vmatpush3.bf16.msra.mxu1 %v493_v44 }
  0x4c   :  { %461 = vmatprep.subr.bf16.mxu1 %v606_v3 }
  0x4d   :  { %442 = vmatpush3.bf16.msra.mxu0 %v486_v20 }
  0x4e   :  { %443 = vmatprep.subr.bf16.mxu0 %v606_v3 }
  0x4f   :  { %462 = vmatpush3.bf16.msra.mxu1 %v494_v45 }
  0x50   :  { %463 = vmatprep.subr.bf16.mxu1 %v606_v3 }
  0x51   :  { %444 = vmatpush3.bf16.msra.mxu0 %v487_v21 }
  0x52   :  { %445 = vmatprep.subr.bf16.mxu0 %v606_v3 }
  0x53   :  { %464 = vmatpush3.bf16.msra.mxu1 %v495_v46 }
  0x54   :  { %465 = vmatprep.subr.bf16.mxu1 %v606_v3 }
  0x55   :  { %446 = vmatpush3.bf16.msra.mxu0 %v488_v22 }
  0x57   :  { %466 = vmatpush3.bf16.msra.mxu1 %v496_v47 }
  0xc5   :  { %v76_v6 = vpop.xlane.xlu0 %75 }
  0xc6   :  { %v79_v7 = vmul.f32 0.03125, %v76_v6 }
  0xc8   :  { %v81_v8 = vsub.f32 %v73_v0, %v79_v7 }
  0xc9   :  { %v78_v9 = vpop.xlane.xlu0 %77 }
  0xca   :  { %v80_v10 = vmul.f32 0.03125, %v78_v9  ;;  %v86_v11 = vsel %vm85_vm0, %v81_v8, 0.0 }
  0xcb   :  { %v88_v12 = vmul.f32 %v86_v11, %v86_v11 }
  0xcc   :  { %v82_v13 = vsub.f32 %v74_v1, %v80_v10 }
  0xcd   :  { %90 = vadd.xlane.f32.xlu1 %v88_v12 }
  0xce   :  { %v87_v14 = vsel %vm85_vm0, %v82_v13, 0.0 }
  0xcf   :  { %v89_v15 = vmul.f32 %v87_v14, %v87_v14 }
  0xd1   :  { %92 = vadd.xlane.f32.xlu1 %v89_v15 }
 0x15a   :  { %v91_v25 = vpop.xlane.xlu1 %90 }
 0x15b   :  { %v94_v26 = vmul.f32 0.03125, %v91_v25 }
 0x15d   :  { %v96_v27 = vadd.f32 1e-05, %v94_v26 }
 0x15e   :  { %v93_v28 = vpop.xlane.xlu1 %92 }
 0x15f   :  { %497 = vrsqrt.f32 %v96_v27  ;;  %v95_v29 = vmul.f32 0.03125, %v93_v28 }
 0x161   :  { %v97_v30 = vadd.f32 1e-05, %v95_v29 }
 0x163   :  { %499 = vrsqrt.f32 %v97_v30 }
 0x169   :  { %v498_v31 = vpop.eup %497 }
 0x16a   :  { %v100_v32 = vmul.f32 %v498_v31, %v86_v11 }
 0x16c   :  { %v109_v36 = vmul.f32 %v393_v33, %v100_v32 }
 0x16d   :  { %v500_v34 = vpop.eup %499 }
 0x16e   :  { %v101_v35 = vmul.f32 %v500_v34, %v87_v14  ;;  %v118_v39 = vadd.f32 %v394_v37, %v109_v36 }
 0x170   :  { %v110_v38 = vmul.f32 %v393_v33, %v101_v35 }
 0x172   :  { %v119_v40 = vadd.f32 %v394_v37, %v110_v38 }
 0x174   :  { %v120_v41 = vpack.c.bf16 %v119_v40, %v118_v39 }
 0x176   :  { %448 = vmatmul.mubr.bf16.vlgmr.msra.gmra.mrb[0].mxu0 %v120_v41 }
 0x249   :  { %v230_v49 = vpop.f32.mrb[0].mxu0 }
 0x24a   :  { %v231_v50 = vadd.f32 %v395_v48, %v230_v49  ;;  %v449_v51 = vpop.f32.mrb[1].mxu0 }
 0x24b   :  { %v233_v52 = vpop.f32.mrb[2].mxu0 }
 0x24c   :  { %v239_v53 = vmul.f32 0.70710677, %v231_v50  ;;  %v234_v54 = vadd.f32 %v395_v48, %v233_v52  ;;  %v450_v55 = vpop.f32.mrb[3].mxu0  ;;  %v237_v60 = vmul.f32 0.5, %v231_v50 }
 0x24e   :  { %501 = verf.f32 %v239_v53  ;;  %v240_v56 = vmul.f32 0.70710677, %v234_v54  ;;  %v238_v61 = vmul.f32 0.5, %v234_v54 }
 0x250   :  { %503 = verf.f32 %v240_v56 }
 0x258   :  { %v502_v57 = vpop.eup %501 }
 0x259   :  { %v243_v58 = vadd.f32 1.0, %v502_v57 }
 0x25a   :  { %v504_v59 = vpop.eup %503 }
 0x25b   :  { %v244_v62 = vadd.f32 1.0, %v504_v59  ;;  %v245_v63 = vmul.f32 %v243_v58, %v237_v60 }
 0x25d   :  { %v246_v0 = vmul.f32 %v244_v62, %v238_v61 }
 0x25f   :  { %v249_v1 = vpack.c.bf16 %v246_v0, %v245_v63 }
 0x261   :  { %468 = vmatmul.mubr.bf16.vlgmr.msra.gmra.mrb[0].mxu1 %v249_v1 }
 0x334   :  { %v348_v3 = vpop.f32.mrb[0].mxu1 }
 0x335   :  { %v371_v4 = vadd.f32 %v412_v2, %v348_v3  ;;  %v469_v5 = vpop.f32.mrb[1].mxu1 }
 0x336   :  { %v351_v6 = vpop.f32.mrb[2].mxu1 }
 0x337   :  { %373 = vst [vmem:[#allocation10] sm:$0xff] %v371_v4  ;;  %v372_v7 = vadd.f32 %v412_v2, %v351_v6  ;;  %v470_v8 = vpop.f32.mrb[3].mxu1 }
 0x339   :  { %374 = vst [vmem:[#allocation10 + $0x8] sm:$0xff] %v372_v7 }
 0x33a   :  { %582 = shalt.err (!%p579_p0)
}
 0x33b   :  { %s583_s24 = scalar_lea.hbm %s746_s7, 256 }
 0x33c   :  { %p584_p1 = scmp.ne.s32.totalorder %s746_s7, %s583_s24  ;;  %p587_p2 = scmp.lt.u32.totalorder %s583_s24, %s746_s7 }
 0x33e   :  { %p589_p3 = pnand %p587_p2, %p584_p1 }
 0x340   :  { %592 = shalt.err (!%p589_p3)
}
 0x341   :  { %386 = dma.vmem_to_hbm [thread:$0]  %s381_s21, 256, %s746_s7, [#allocation6], %s603_s3, %s603_s3, %s604_s25  }
 0x342   :  { %597 = dma.done.wait [#allocation6], 256  }
 0x343   :  { %598 = vsyncadd [#allocation6], 4294967040 }
 0x344   :  { %390 = vsyncpa [#allocation5], 1 }
 0x345   :  { %391 = vsyncpa [#allocation8], 1 }
 0x346   :  { %392 = vsyncpa [#allocation6], 1 }

</bundles_post_ra>
